<compile_context>
chip_gen: v5e
topology: v5e:2x2
jax: 0.10.0
libtpu: 0.0.40
codegen_flags: <defaults>
</compile_context>

<pallas_src>
import jax
import jax.numpy as jnp
from jax.experimental import pallas as pl
from jax.experimental.pallas import tpu as pltpu

POS_IN = 9            # encode_box feature count
ENC_PAD = 16          # padded feature rows: 9 features + 1 mask/ones row + 6 zeros
POS_H = 32            # hidden width of Linear(9, 32) / BatchNorm1d(32)
POS_OUT = 128         # output width of Linear(32, 128)
BN_EPS = 1e-5
CENTER = 0.25         # feature pre-centering for numerically stable BN moments
DEFAULT_TILE = 2048   # boxes per grid step (lane axis; multiple of 128)


def _round_up(x, m):
    return ((x + m - 1) // m) * m


def _make_pos_kernel(n_valid, tile, matmul_bf16):
    """Fused encode_box + pos_embed kernel for fixed (n_valid, tile)."""
    mm_dtype = jnp.bfloat16 if matmul_bf16 else jnp.float32
    inv_n = 1.0 / float(n_valid)
    n_zero_rows = ENC_PAD - POS_IN - 1   # 6

    def kernel(packed_ref, w1t_ref, w2ft_ref, b2ft_ref, out_ref,
               gram_ref, wcomb_ref):
        p = pl.program_id(1)      # 0: accumulate BN moments, 1: fold + emit
        t = pl.program_id(2)      # box tile

        # ---- encode_box, lane-major: each row is one feature over `tile` boxes
        data = packed_ref[...]                          # (8, tile): x1,y1,x2,y2,wid,hei,1,1
        x1, y1 = data[0:1, :], data[1:2, :]
        x2, y2 = data[2:3, :], data[3:4, :]
        inv_w = pl.reciprocal(data[4:5, :], approx=True)    # EUP slot (~free)
        inv_h = pl.reciprocal(data[5:6, :], approx=True)
        bw = x2 - x1 + 1.0
        bh = y2 - y1 + 1.0
        cx = x1 + 0.5 * bw
        cy = y1 + 0.5 * bh
        f_w = bw * inv_w
        f_h = bh * inv_h
        # Feature order: w/wid, h/hei, cx/wid, cy/hei, x1/wid, y1/hei,
        #                x2/wid, y2/hei, wh/(wid*hei)
        enc = jnp.concatenate(
            [f_w, f_h, cx * inv_w, cy * inv_h,
             x1 * inv_w, y1 * inv_h, x2 * inv_w, y2 * inv_h, f_w * f_h],
            axis=0)                                      # (9, tile)

        @pl.when(p == 0)
        def _accumulate_moments():
            # Fresh statistics at the start of each branch's pass 0.
            @pl.when(t == 0)
            def _zero():
                gram_ref[...] = jnp.zeros_like(gram_ref)

            lane = jax.lax.broadcasted_iota(jnp.int32, (1, tile), 1)
            mask = ((t * tile + lane) < n_valid).astype(jnp.float32)   # (1, tile)
            # Centered, masked encode features + mask row (the mask row makes
            # G[:, 9] the per-feature column sum -- no separate reduction).
            encx = jnp.concatenate(
                [(enc - CENTER) * mask, mask,
                 jnp.zeros((n_zero_rows, tile), jnp.float32)], axis=0)  # (16, tile)
            gram_ref[...] += jax.lax.dot_general(
                encx, encx, (((1,), (1,)), ((), ())),
                preferred_element_type=jnp.float32)                     # (16, 16)

        @pl.when(p == 1)
        def _emit():
            # Fold BN into one (128, 16) weight once per branch.
            @pl.when(t == 0)
            def _fold_bn_into_weights():
                g = gram_ref[...]                        # (16, 16)
                w1t = w1t_ref[...]                       # (32, 16), cols 9..15 are 0
                u = g[POS_IN:POS_IN + 1, :] * inv_n      # (1, 16): mean(enc) - CENTER
                mu_c = jnp.sum(w1t * u, axis=1, keepdims=True)              # (32, 1)
                ex2 = jnp.sum(jnp.dot(w1t, g, preferred_element_type=jnp.float32)
                              * w1t, axis=1, keepdims=True) * inv_n          # (32, 1)
                var = jnp.maximum(ex2 - mu_c * mu_c, 0.0)    # biased (train-mode BN)
                inv_std = jax.lax.rsqrt(var + BN_EPS)                        # (32, 1)
                mean_h1 = mu_c + CENTER * jnp.sum(w1t, axis=1, keepdims=True)
                bias_col = (jax.lax.broadcasted_iota(jnp.int32, (1, ENC_PAD), 1)
                            == POS_IN).astype(jnp.float32)                   # (1, 16)
                # Columns 0..8: diag(inv_std) @ w1^T ; column 9: -mean*inv_std.
                r = inv_std * w1t - (mean_h1 * inv_std) * bias_col           # (32, 16)
                wcomb = (jnp.dot(w2ft_ref[...], r,
                                 preferred_element_type=jnp.float32)
                         + b2ft_ref[...] * bias_col)                         # (128, 16)
                wcomb_ref[...] = wcomb.astype(mm_dtype)

            # Single 16->128 MXU matmul per tile; bias via the constant-1 row.
            encb = jnp.concatenate(
                [enc, jnp.ones((1, tile), jnp.float32),
                 jnp.zeros((n_zero_rows, tile), jnp.float32)], axis=0)  # (16, tile)
            h2 = jnp.dot(wcomb_ref[...], encb.astype(mm_dtype),
                         preferred_element_type=jnp.float32)            # (128, tile)
            out_ref[...] = jnp.maximum(h2, 0.0).astype(out_ref.dtype)

    return kernel


def pos_embed_pallas(head_boxes, tail_boxes, sizes, params, *,
                     tile=DEFAULT_TILE, matmul_bf16=True,
                     out_dtype=jnp.float32):
    """Fused encode_box + pos_embed for the head AND tail branch in one call.

    head_boxes / tail_boxes : (N, 4) xyxy boxes
    sizes                   : (N, 2) per-box (image_width, image_height)
    Returns (head_embed, tail_embed), each (N, 128).
    BN batch statistics are computed independently per branch (as in PyTorch,
    where pos_embed is called once per branch).
    """
    n = int(head_boxes.shape[0])
    assert n > 0

    # Fold BN affine (gamma/beta) into Linear(32,128); b1 cancels exactly under
    # train-mode (batch statistics) BN centering.
    gamma = params["gamma"].reshape(POS_H, 1).astype(jnp.float32)
    w2f = (gamma * params["w2"]).astype(jnp.float32)                    # (32, 128)
    b2f = (params["beta"].reshape(1, POS_H) @ params["w2"]
           + params["b2"].reshape(1, POS_OUT)).astype(jnp.float32)      # (1, 128)

    # Transposed / padded weights for the lane-major kernel.
    w1t = jnp.concatenate(
        [params["w1"].T.astype(jnp.float32),
         jnp.zeros((POS_H, ENC_PAD - POS_IN), jnp.float32)], axis=1)    # (32, 16)
    w2ft = w2f.T                                                        # (128, 32)
    b2ft = b2f.T                                                        # (128, 1)

    tile = max(128, (int(tile) // 128) * 128)          # lane axis: multiple of 128
    tile = min(tile, _round_up(n, 128))
    n_pad = _round_up(n, tile)
    n_tiles = n_pad // tile

    def pack(boxes):
        # (8, n_pad) = x1, y1, x2, y2, wid, hei, 1, 1 ; padded columns use 1.0
        # everywhere (finite math; masked out of BN stats, sliced off output).
        cols = jnp.concatenate(
            [boxes.astype(jnp.float32).T, sizes.astype(jnp.float32).T,
             jnp.ones((2, n), jnp.float32)], axis=0)
        return jnp.pad(cols, ((0, 0), (0, n_pad - n)), constant_values=1.0)

    packed = jnp.stack([pack(head_boxes), pack(tail_boxes)], axis=0)    # (2, 8, n_pad)

    out = pl.pallas_call(
        _make_pos_kernel(n, tile, matmul_bf16),
        out_shape=jax.ShapeDtypeStruct((2, POS_OUT, n_pad), out_dtype),
        grid_spec=pltpu.PrefetchScalarGridSpec(
            num_scalar_prefetch=0,
            grid=(2, 2, n_tiles),                   # (branch, BN pass, box tile)
            in_specs=[
                pl.BlockSpec((None, 8, tile), lambda b, p, t: (b, 0, t)),
                pl.BlockSpec((POS_H, ENC_PAD), lambda b, p, t: (0, 0)),
                pl.BlockSpec((POS_OUT, POS_H), lambda b, p, t: (0, 0)),
                pl.BlockSpec((POS_OUT, 1), lambda b, p, t: (0, 0)),
            ],
            # Pass 0 emits nothing: park the output window on block (b,0,0) so
            # it is only written back after pass 1 fills it (block (b,0,0) is
            # revisited at p=1,t=0).  Covered by the multi-tile test below.
            out_specs=pl.BlockSpec((None, POS_OUT, tile),
                                   lambda b, p, t: (b, 0, t * p)),
            scratch_shapes=[
                pltpu.VMEM((ENC_PAD, ENC_PAD), jnp.float32),       # encode Gram
                pltpu.VMEM((POS_OUT, ENC_PAD),                     # folded weights
                           jnp.bfloat16 if matmul_bf16 else jnp.float32),
            ]),
        compiler_params=pltpu.CompilerParams(
            dimension_semantics=("parallel", "arbitrary", "arbitrary"),
            vmem_limit_bytes=32 * 1024 * 1024),
    )(packed, w1t, w2ft, b2ft)

    head_embed = out[0, :, :n].T        # (N, 128)
    tail_embed = out[1, :, :n].T
    return head_embed, tail_embed


def pos_embed_reference(boxes, sizes, params):
    """Pure-JAX reference of the original (un-folded) PyTorch formula."""
    hi = jax.lax.Precision.HIGHEST
    wid, hei = sizes[:, 0:1], sizes[:, 1:2]
    x1, y1, x2, y2 = boxes[:, 0:1], boxes[:, 1:2], boxes[:, 2:3], boxes[:, 3:4]
    w = x2 - x1 + 1.0
    h = y2 - y1 + 1.0
    cx = x1 + 0.5 * w
    cy = y1 + 0.5 * h
    info = jnp.concatenate(
        [w / wid, h / hei, cx / wid, cy / hei,
         x1 / wid, y1 / hei, x2 / wid, y2 / hei,
         (w * h) / (wid * hei)], axis=-1)
    h1 = jnp.dot(info, params["w1"], precision=hi) + params["b1"]
    mean = jnp.mean(h1, axis=0, keepdims=True)
    var = jnp.mean((h1 - mean) ** 2, axis=0, keepdims=True)
    h1n = (h1 - mean) * jax.lax.rsqrt(var + BN_EPS) * params["gamma"] + params["beta"]
    h2 = jnp.dot(h1n, params["w2"], precision=hi) + params["b2"]
    return jnp.maximum(h2, 0.0)


def cross_node_generate(proposal_sizes, cross_head_feature, cross_tail_feature,
                        cross_head_boxes, cross_tail_boxes, obj_embed,
                        rel_pair_idxs, cross_idx_matrix, params,
                        use_pallas=True):
    """JAX port of CrossNodeGenerate.forward.

    proposal_sizes : list of (wid, hei) per image (BoxList.size, 'xyxy').
    All other args mirror the PyTorch signature (lists are per-image).
    """
    # TODO(synk): ragged per-image gathers stay in plain JAX (data-dependent glue).
    head_obj_embed = []
    tail_obj_embed = []
    for emb, pair_idx, idx in zip(obj_embed, rel_pair_idxs, cross_idx_matrix):
        head_obj_embed.append(emb[pair_idx[:, 0]][idx])
        tail_obj_embed.append(emb[pair_idx[:, 1]][idx])
    head_obj_embed = jnp.concatenate(head_obj_embed, axis=0)
    tail_obj_embed = jnp.concatenate(tail_obj_embed, axis=0)

    head_boxes = jnp.concatenate(cross_head_boxes, axis=0)
    tail_boxes = jnp.concatenate(cross_tail_boxes, axis=0)
    # head/tail cross boxes share per-image counts and image sizes.
    sizes = jnp.concatenate([
        jnp.broadcast_to(jnp.asarray(sz, jnp.float32)[None, :], (b.shape[0], 2))
        for sz, b in zip(proposal_sizes, cross_head_boxes)], axis=0)

    if use_pallas:
        head_embed, tail_embed = pos_embed_pallas(head_boxes, tail_boxes,
                                                  sizes, params)
    else:
        head_embed = pos_embed_reference(head_boxes, sizes, params)
        tail_embed = pos_embed_reference(tail_boxes, sizes, params)

    cross_head_pre_rep = jnp.concatenate(
        (cross_head_feature, head_obj_embed, head_embed), axis=-1)
    cross_tail_pre_rep = jnp.concatenate(
        (cross_tail_feature, tail_obj_embed, tail_embed), axis=-1)
    return cross_head_pre_rep, cross_tail_pre_rep


def init_params(key):
    k1, k2, k3, k4, k5, k6 = jax.random.split(key, 6)
    return {
        # nn.Linear(9, 32): stored as (in, out)
        "w1": 0.1 * jax.random.normal(k1, (POS_IN, POS_H), jnp.float32),
        "b1": 0.1 * jax.random.normal(k2, (1, POS_H), jnp.float32),
        # nn.BatchNorm1d(32) affine params
        "gamma": 1.0 + 0.1 * jax.random.normal(k3, (1, POS_H), jnp.float32),
        "beta": 0.1 * jax.random.normal(k4, (1, POS_H), jnp.float32),
        # nn.Linear(32, 128)
        "w2": 0.1 * jax.random.normal(k5, (POS_H, POS_OUT), jnp.float32),
        "b2": 0.1 * jax.random.normal(k6, (1, POS_OUT), jnp.float32),
    }


def _random_boxes(key, n, wid, hei):
    kx, ky, kw, kh = jax.random.split(key, 4)
    x1 = jax.random.uniform(kx, (n, 1), jnp.float32, 0.0, wid * 0.5)
    y1 = jax.random.uniform(ky, (n, 1), jnp.float32, 0.0, hei * 0.5)
    bw = jax.random.uniform(kw, (n, 1), jnp.float32, 1.0, wid * 0.4)
    bh = jax.random.uniform(kh, (n, 1), jnp.float32, 1.0, hei * 0.4)
    return jnp.concatenate([x1, y1, x1 + bw, y1 + bh], axis=-1)


if __name__ == "__main__":
    root = jax.random.PRNGKey(0)
    keys = jax.random.split(root, 16)
    params = init_params(keys[0])

    # Small synthetic shapes (2 images).
    feat_dim = 32          # cross_*_feature channel dim
    obj_dim = 16           # obj_embed channel dim
    num_objs = [5, 7]
    num_rels = [8, 12]
    num_cross = [6, 10]
    image_sizes = [(64.0, 48.0), (80.0, 60.0)]   # (wid, hei), 'xyxy' proposals
    total_cross = sum(num_cross)

    obj_embed = [
        jax.random.normal(keys[1], (num_objs[0], obj_dim), jnp.float32),
        jax.random.normal(keys[2], (num_objs[1], obj_dim), jnp.float32),
    ]
    rel_pair_idxs = [
        jax.random.randint(keys[3], (num_rels[0], 2), 0, num_objs[0]),
        jax.random.randint(keys[4], (num_rels[1], 2), 0, num_objs[1]),
    ]
    cross_idx_matrix = [
        jax.random.randint(keys[5], (num_cross[0],), 0, num_rels[0]),
        jax.random.randint(keys[6], (num_cross[1],), 0, num_rels[1]),
    ]
    cross_head_boxes = [
        _random_boxes(keys[7], num_cross[0], *image_sizes[0]),
        _random_boxes(keys[8], num_cross[1], *image_sizes[1]),
    ]
    cross_tail_boxes = [
        _random_boxes(keys[9], num_cross[0], *image_sizes[0]),
        _random_boxes(keys[10], num_cross[1], *image_sizes[1]),
    ]
    cross_head_feature = jax.random.normal(keys[11], (total_cross, feat_dim),
                                           jnp.float32)
    cross_tail_feature = jax.random.normal(keys[12], (total_cross, feat_dim),
                                           jnp.float32)

    head_rep, tail_rep = cross_node_generate(
        image_sizes, cross_head_feature, cross_tail_feature,
        cross_head_boxes, cross_tail_boxes, obj_embed,
        rel_pair_idxs, cross_idx_matrix, params, use_pallas=True)
    jax.block_until_ready((head_rep, tail_rep))

    # Validate against the pure-JAX reference of the original formula.
    # Tolerance 3e-2 absorbs the bf16 folded 16->128 matmul + approx reciprocals.
    head_ref, tail_ref = cross_node_generate(
        image_sizes, cross_head_feature, cross_tail_feature,
        cross_head_boxes, cross_tail_boxes, obj_embed,
        rel_pair_idxs, cross_idx_matrix, params, use_pallas=False)

    assert head_rep.shape == (total_cross, feat_dim + obj_dim + POS_OUT)
    assert tail_rep.shape == (total_cross, feat_dim + obj_dim + POS_OUT)
    assert jnp.allclose(head_rep, head_ref, rtol=3e-2, atol=3e-2)
    assert jnp.allclose(tail_rep, tail_ref, rtol=3e-2, atol=3e-2)

    # Robustness check: multi-tile grid + lane padding/masking + output-block
    # revisit path (n_tiles > 1 on both branches).
    kb = jax.random.split(keys[13], 3)
    n_big = 700
    big_sizes = jnp.tile(jnp.array([[96.0, 72.0]], jnp.float32), (n_big, 1))
    big_head = _random_boxes(kb[0], n_big, 96.0, 72.0)
    big_tail = _random_boxes(kb[1], n_big, 96.0, 72.0)
    bh_out, bt_out = pos_embed_pallas(big_head, big_tail, big_sizes, params,
                                      tile=256)
    jax.block_until_ready((bh_out, bt_out))
    bh_ref = pos_embed_reference(big_head, big_sizes, params)
    bt_ref = pos_embed_reference(big_tail, big_sizes, params)
    assert jnp.allclose(bh_out, bh_ref, rtol=3e-2, atol=3e-2)
    assert jnp.allclose(bt_out, bt_ref, rtol=3e-2, atol=3e-2)

    print("KERNEL_OK")
</pallas_src>

<mosaic_0001>
module attributes {stable_mosaic.version = 11 : i64} {
  func.func @kernel(%arg0: i32, %arg1: i32, %arg2: i32, %arg3: memref<1x8x128xf32, #tpu.memory_space<vmem>>, %arg4: memref<32x16xf32, #tpu.memory_space<vmem>>, %arg5: memref<128x32xf32, #tpu.memory_space<vmem>>, %arg6: memref<128x1xf32, #tpu.memory_space<vmem>>, %arg7: memref<1x128x128xf32, #tpu.memory_space<vmem>>, %arg8: memref<16x16xf32, #tpu.memory_space<vmem>>, %arg9: memref<128x16xbf16, #tpu.memory_space<vmem>>) attributes {dimension_semantics = [#tpu.dimension_semantics<parallel>, #tpu.dimension_semantics<arbitrary>, #tpu.dimension_semantics<arbitrary>], iteration_bounds = array<i64: 2, 2, 1>, scalar_prefetch = 0 : i64, scratch_operands = 2 : i64, tpu.core_type = #tpu.core_type<tc>, window_params = [{transform_indices = @transform_0, window_bounds = array<i64: 1, 8, 128>}, {pipeline_mode = #tpu.pipeline_mode<synchronous>, transform_indices = @transform_1, window_bounds = array<i64: 32, 16>}, {pipeline_mode = #tpu.pipeline_mode<synchronous>, transform_indices = @transform_2, window_bounds = array<i64: 128, 32>}, {pipeline_mode = #tpu.pipeline_mode<synchronous>, transform_indices = @transform_3, window_bounds = array<i64: 128, 1>}, {transform_indices = @transform_4, window_bounds = array<i64: 1, 128, 128>}]} {
    %c0 = arith.constant 0 : index
    %c0_0 = arith.constant 0 : index
    %c0_1 = arith.constant 0 : index
    %0 = vector.load %arg3[%c0, %c0_0, %c0_1] : memref<1x8x128xf32, #tpu.memory_space<vmem>>, vector<1x8x128xf32>
    %1 = vector.shape_cast %0 : vector<1x8x128xf32> to vector<8x128xf32>
    %2 = vector.extract_strided_slice %1 {offsets = [0, 0], sizes = [1, 128], strides = [1, 1]} : vector<8x128xf32> to vector<1x128xf32>
    %3 = vector.extract_strided_slice %1 {offsets = [1, 0], sizes = [1, 128], strides = [1, 1]} : vector<8x128xf32> to vector<1x128xf32>
    %4 = vector.extract_strided_slice %1 {offsets = [2, 0], sizes = [1, 128], strides = [1, 1]} : vector<8x128xf32> to vector<1x128xf32>
    %5 = vector.extract_strided_slice %1 {offsets = [3, 0], sizes = [1, 128], strides = [1, 1]} : vector<8x128xf32> to vector<1x128xf32>
    %6 = vector.extract_strided_slice %1 {offsets = [4, 0], sizes = [1, 128], strides = [1, 1]} : vector<8x128xf32> to vector<1x128xf32>
    %7 = tpu.reciprocal %6 {approx = true} : vector<1x128xf32> -> vector<1x128xf32>
    %8 = vector.extract_strided_slice %1 {offsets = [5, 0], sizes = [1, 128], strides = [1, 1]} : vector<8x128xf32> to vector<1x128xf32>
    %9 = tpu.reciprocal %8 {approx = true} : vector<1x128xf32> -> vector<1x128xf32>
    %10 = arith.subf %4, %2 : vector<1x128xf32>
    %cst = arith.constant 1.000000e+00 : f32
    %11 = vector.broadcast %cst : f32 to vector<1x128xf32>
    %12 = arith.addf %10, %11 : vector<1x128xf32>
    %13 = arith.subf %5, %3 : vector<1x128xf32>
    %cst_2 = arith.constant 1.000000e+00 : f32
    %14 = vector.broadcast %cst_2 : f32 to vector<1x128xf32>
    %15 = arith.addf %13, %14 : vector<1x128xf32>
    %cst_3 = arith.constant 5.000000e-01 : f32
    %16 = vector.broadcast %cst_3 : f32 to vector<1x128xf32>
    %17 = arith.mulf %16, %12 : vector<1x128xf32>
    %18 = arith.addf %2, %17 : vector<1x128xf32>
    %cst_4 = arith.constant 5.000000e-01 : f32
    %19 = vector.broadcast %cst_4 : f32 to vector<1x128xf32>
    %20 = arith.mulf %19, %15 : vector<1x128xf32>
    %21 = arith.addf %3, %20 : vector<1x128xf32>
    %22 = arith.mulf %12, %7 : vector<1x128xf32>
    %23 = arith.mulf %15, %9 : vector<1x128xf32>
    %24 = arith.mulf %18, %7 : vector<1x128xf32>
    %25 = arith.mulf %21, %9 : vector<1x128xf32>
    %26 = arith.mulf %2, %7 : vector<1x128xf32>
    %27 = arith.mulf %3, %9 : vector<1x128xf32>
    %28 = arith.mulf %4, %7 : vector<1x128xf32>
    %29 = arith.mulf %5, %9 : vector<1x128xf32>
    %30 = arith.mulf %22, %23 : vector<1x128xf32>
    %31 = tpu.concatenate %22, %23, %24, %25, %26, %27, %28, %29, %30 in 0 : vector<1x128xf32>, vector<1x128xf32>, vector<1x128xf32>, vector<1x128xf32>, vector<1x128xf32>, vector<1x128xf32>, vector<1x128xf32>, vector<1x128xf32>, vector<1x128xf32> -> vector<9x128xf32>
    %c0_i32 = arith.constant 0 : i32
    %32 = arith.cmpi eq, %arg1, %c0_i32 : i32
    %33 = arith.extui %32 : i1 to i32
    %c0_i32_5 = arith.constant 0 : i32
    %34 = arith.cmpi ne, %33, %c0_i32_5 : i32
    scf.if %34 {
      %c0_i32_7 = arith.constant 0 : i32
      %38 = arith.cmpi eq, %arg2, %c0_i32_7 : i32
      %39 = arith.extui %38 : i1 to i32
      %c0_i32_8 = arith.constant 0 : i32
      %40 = arith.cmpi ne, %39, %c0_i32_8 : i32
      scf.if %40 {
        %cst_16 = arith.constant 0.000000e+00 : f32
        %59 = vector.broadcast %cst_16 : f32 to vector<16x16xf32>
        %c0_17 = arith.constant 0 : index
        %c0_18 = arith.constant 0 : index
        %60 = vector.load %arg8[%c0_17, %c0_18] : memref<16x16xf32, #tpu.memory_space<vmem>>, vector<16x16xf32>
        tpu.vector_store %arg8[%c0_17, %c0_18], %59 {strides = array<i32>} : memref<16x16xf32, #tpu.memory_space<vmem>>, vector<16x16xf32>,
      } else {
      }
      %41 = tpu.iota {dimensions = array<i32: 1>} : vector<1x128xi32>
      %c128_i32 = arith.constant 128 : i32
      %42 = arith.muli %arg2, %c128_i32 : i32
      %43 = vector.broadcast %42 : i32 to vector<1x128xi32>
      %44 = arith.addi %43, %41 : vector<1x128xi32>
      %c16_i32 = arith.constant 16 : i32
      %45 = vector.broadcast %c16_i32 : i32 to vector<1x128xi32>
      %46 = arith.cmpi slt, %44, %45 : vector<1x128xi32>
      %47 = arith.extui %46 : vector<1x128xi1> to vector<1x128xi32>
      %48 = arith.sitofp %47 : vector<1x128xi32> to vector<1x128xf32>
      %cst_9 = arith.constant 2.500000e-01 : f32
      %49 = vector.broadcast %cst_9 : f32 to vector<9x128xf32>
      %50 = arith.subf %31, %49 : vector<9x128xf32>
      %51 = vector.broadcast %48 : vector<1x128xf32> to vector<9x128xf32>
      %52 = arith.mulf %50, %51 : vector<9x128xf32>
      %cst_10 = arith.constant 0.000000e+00 : f32
      %53 = vector.broadcast %cst_10 : f32 to vector<6x128xf32>
      %54 = tpu.concatenate %52, %48, %53 in 0 : vector<9x128xf32>, vector<1x128xf32>, vector<6x128xf32> -> vector<16x128xf32>
      %c0_11 = arith.constant 0 : index
      %c0_12 = arith.constant 0 : index
      %55 = vector.load %arg8[%c0_11, %c0_12] : memref<16x16xf32, #tpu.memory_space<vmem>>, vector<16x16xf32>
      %cst_13 = arith.constant dense<0.000000e+00> : vector<16x16xf32>
      %56 = tpu.matmul %54, %54, %cst_13 {dimension_numbers = #tpu.dot_dimension_numbers<[1], [1], [0], [0], [0, 0, 1, 0], [], []>} : vector<16x128xf32>, vector<16x128xf32>, vector<16x16xf32> -> vector<16x16xf32>
      %57 = arith.addf %55, %56 : vector<16x16xf32>
      %c0_14 = arith.constant 0 : index
      %c0_15 = arith.constant 0 : index
      %58 = vector.load %arg8[%c0_14, %c0_15] : memref<16x16xf32, #tpu.memory_space<vmem>>, vector<16x16xf32>
      tpu.vector_store %arg8[%c0_14, %c0_15], %57 {strides = array<i32>} : memref<16x16xf32, #tpu.memory_space<vmem>>, vector<16x16xf32>,
    } else {
    }
    %c1_i32 = arith.constant 1 : i32
    %35 = arith.cmpi eq, %arg1, %c1_i32 : i32
    %36 = arith.extui %35 : i1 to i32
    %c0_i32_6 = arith.constant 0 : i32
    %37 = arith.cmpi ne, %36, %c0_i32_6 : i32
    scf.if %37 {
      %c0_i32_7 = arith.constant 0 : i32
      %38 = arith.cmpi eq, %arg2, %c0_i32_7 : i32
      %39 = arith.extui %38 : i1 to i32
      %c0_i32_8 = arith.constant 0 : i32
      %40 = arith.cmpi ne, %39, %c0_i32_8 : i32
      scf.if %40 {
        %c0_18 = arith.constant 0 : index
        %c0_19 = arith.constant 0 : index
        %52 = vector.load %arg8[%c0_18, %c0_19] : memref<16x16xf32, #tpu.memory_space<vmem>>, vector<16x16xf32>
        %c0_20 = arith.constant 0 : index
        %c0_21 = arith.constant 0 : index
        %53 = vector.load %arg4[%c0_20, %c0_21] : memref<32x16xf32, #tpu.memory_space<vmem>>, vector<32x16xf32>
        %54 = vector.extract_strided_slice %52 {offsets = [9, 0], sizes = [1, 16], strides = [1, 1]} : vector<16x16xf32> to vector<1x16xf32>
        %cst_22 = arith.constant 6.250000e-02 : f32
        %55 = vector.broadcast %cst_22 : f32 to vector<1x16xf32>
        %56 = arith.mulf %54, %55 : vector<1x16xf32>
        %57 = vector.broadcast %56 : vector<1x16xf32> to vector<32x16xf32>
        %58 = arith.mulf %53, %57 : vector<32x16xf32>
        %cst_23 = arith.constant dense<0.000000e+00> : vector<32xf32>
        %59 = vector.multi_reduction <add>, %58, %cst_23 [1] : vector<32x16xf32> to vector<32xf32>
        %60 = vector.shape_cast %59 : vector<32xf32> to vector<32x1xf32>
        %cst_24 = arith.constant dense<0.000000e+00> : vector<32x16xf32>
        %61 = tpu.matmul %53, %52, %cst_24 {dimension_numbers = #tpu.dot_dimension_numbers<[1], [0], [0], [1], [0, 0, 1, 1], [], []>} : vector<32x16xf32>, vector<16x16xf32>, vector<32x16xf32> -> vector<32x16xf32>
        %62 = arith.mulf %61, %53 : vector<32x16xf32>
        %cst_25 = arith.constant dense<0.000000e+00> : vector<32xf32>
        %63 = vector.multi_reduction <add>, %62, %cst_25 [1] : vector<32x16xf32> to vector<32xf32>
        %64 = vector.shape_cast %63 : vector<32xf32> to vector<32x1xf32>
        %cst_26 = arith.constant 6.250000e-02 : f32
        %65 = vector.broadcast %cst_26 : f32 to vector<32x1xf32>
        %66 = arith.mulf %64, %65 : vector<32x1xf32>
        %67 = arith.mulf %60, %60 : vector<32x1xf32>
        %68 = arith.subf %66, %67 : vector<32x1xf32>
        %cst_27 = arith.constant 0.000000e+00 : f32
        %69 = vector.broadcast %cst_27 : f32 to vector<32x1xf32>
        %70 = arith.maximumf %68, %69 : vector<32x1xf32>
        %cst_28 = arith.constant 9.99999974E-6 : f32
        %71 = vector.broadcast %cst_28 : f32 to vector<32x1xf32>
        %72 = arith.addf %70, %71 : vector<32x1xf32>
        %73 = math.rsqrt %72 : vector<32x1xf32>
        %cst_29 = arith.constant dense<0.000000e+00> : vector<32xf32>
        %74 = vector.multi_reduction <add>, %53, %cst_29 [1] : vector<32x16xf32> to vector<32xf32>
        %75 = vector.shape_cast %74 : vector<32xf32> to vector<32x1xf32>
        %cst_30 = arith.constant 2.500000e-01 : f32
        %76 = vector.broadcast %cst_30 : f32 to vector<32x1xf32>
        %77 = arith.mulf %76, %75 : vector<32x1xf32>
        %78 = arith.addf %60, %77 : vector<32x1xf32>
        %79 = tpu.iota {dimensions = array<i32: 1>} : vector<1x16xi32>
        %c9_i32 = arith.constant 9 : i32
        %80 = vector.broadcast %c9_i32 : i32 to vector<1x16xi32>
        %81 = arith.cmpi eq, %79, %80 : vector<1x16xi32>
        %82 = arith.extui %81 : vector<1x16xi1> to vector<1x16xi32>
        %83 = arith.sitofp %82 : vector<1x16xi32> to vector<1x16xf32>
        %84 = vector.broadcast %73 : vector<32x1xf32> to vector<32x16xf32>
        %85 = arith.mulf %84, %53 : vector<32x16xf32>
        %86 = arith.mulf %78, %73 : vector<32x1xf32>
        %87 = vector.broadcast %86 : vector<32x1xf32> to vector<32x16xf32>
        %88 = vector.broadcast %83 : vector<1x16xf32> to vector<32x16xf32>
        %89 = arith.mulf %87, %88 : vector<32x16xf32>
        %90 = arith.subf %85, %89 : vector<32x16xf32>
        %c0_31 = arith.constant 0 : index
        %c0_32 = arith.constant 0 : index
        %91 = vector.load %arg5[%c0_31, %c0_32] : memref<128x32xf32, #tpu.memory_space<vmem>>, vector<128x32xf32>
        %cst_33 = arith.constant dense<0.000000e+00> : vector<128x16xf32>
        %92 = tpu.matmul %91, %90, %cst_33 {dimension_numbers = #tpu.dot_dimension_numbers<[1], [0], [0], [1], [0, 0, 1, 1], [], []>} : vector<128x32xf32>, vector<32x16xf32>, vector<128x16xf32> -> vector<128x16xf32>
        %c0_34 = arith.constant 0 : index
        %c0_35 = arith.constant 0 : index
        %93 = vector.load %arg6[%c0_34, %c0_35] : memref<128x1xf32, #tpu.memory_space<vmem>>, vector<128x1xf32>
        %94 = vector.broadcast %93 : vector<128x1xf32> to vector<128x16xf32>
        %95 = vector.broadcast %83 : vector<1x16xf32> to vector<128x16xf32>
        %96 = arith.mulf %94, %95 : vector<128x16xf32>
        %97 = arith.addf %92, %96 : vector<128x16xf32>
        %98 = arith.truncf %97 : vector<128x16xf32> to vector<128x16xbf16>
        %c0_36 = arith.constant 0 : index
        %c0_37 = arith.constant 0 : index
        %99 = vector.load %arg9[%c0_36, %c0_37] : memref<128x16xbf16, #tpu.memory_space<vmem>>, vector<128x16xbf16>
        tpu.vector_store %arg9[%c0_36, %c0_37], %98 {strides = array<i32>} : memref<128x16xbf16, #tpu.memory_space<vmem>>, vector<128x16xbf16>,
      } else {
      }
      %cst_9 = arith.constant 1.000000e+00 : f32
      %41 = vector.broadcast %cst_9 : f32 to vector<1x128xf32>
      %cst_10 = arith.constant 0.000000e+00 : f32
      %42 = vector.broadcast %cst_10 : f32 to vector<6x128xf32>
      %43 = tpu.concatenate %31, %41, %42 in 0 : vector<9x128xf32>, vector<1x128xf32>, vector<6x128xf32> -> vector<16x128xf32>
      %c0_11 = arith.constant 0 : index
      %c0_12 = arith.constant 0 : index
      %44 = vector.load %arg9[%c0_11, %c0_12] : memref<128x16xbf16, #tpu.memory_space<vmem>>, vector<128x16xbf16>
      %45 = arith.truncf %43 : vector<16x128xf32> to vector<16x128xbf16>
      %cst_13 = arith.constant dense<0.000000e+00> : vector<128x128xf32>
      %46 = tpu.matmul %44, %45, %cst_13 {dimension_numbers = #tpu.dot_dimension_numbers<[1], [0], [0], [1], [0, 0, 1, 1], [], []>} : vector<128x16xbf16>, vector<16x128xbf16>, vector<128x128xf32> -> vector<128x128xf32>
      %cst_14 = arith.constant 0.000000e+00 : f32
      %47 = vector.broadcast %cst_14 : f32 to vector<128x128xf32>
      %48 = arith.maximumf %46, %47 : vector<128x128xf32>
      %c0_15 = arith.constant 0 : index
      %c0_16 = arith.constant 0 : index
      %c0_17 = arith.constant 0 : index
      %49 = vector.load %arg7[%c0_15, %c0_16, %c0_17] : memref<1x128x128xf32, #tpu.memory_space<vmem>>, vector<1x128x128xf32>
      %50 = vector.shape_cast %49 : vector<1x128x128xf32> to vector<128x128xf32>
      %51 = vector.shape_cast %48 : vector<128x128xf32> to vector<1x128x128xf32>
      tpu.vector_store %arg7[%c0_15, %c0_16, %c0_17], %51 {strides = array<i32>} : memref<1x128x128xf32, #tpu.memory_space<vmem>>, vector<1x128x128xf32>,
    } else {
    }
    return
  }
  func.func @transform_0(%arg0: i32, %arg1: i32, %arg2: i32) -> (i32, i32, i32) {
    %c0_i32 = arith.constant 0 : i32
    %c0_i32_0 = arith.constant 0 : i32
    return %arg0, %c0_i32, %arg2 : i32, i32, i32
  }
  func.func @transform_1(%arg0: i32, %arg1: i32, %arg2: i32) -> (i32, i32) {
    %c0_i32 = arith.constant 0 : i32
    %c0_i32_0 = arith.constant 0 : i32
    %c0_i32_1 = arith.constant 0 : i32
    return %c0_i32, %c0_i32_0 : i32, i32
  }
  func.func @transform_2(%arg0: i32, %arg1: i32, %arg2: i32) -> (i32, i32) {
    %c0_i32 = arith.constant 0 : i32
    %c0_i32_0 = arith.constant 0 : i32
    %c0_i32_1 = arith.constant 0 : i32
    return %c0_i32, %c0_i32_0 : i32, i32
  }
  func.func @transform_3(%arg0: i32, %arg1: i32, %arg2: i32) -> (i32, i32) {
    %c0_i32 = arith.constant 0 : i32
    %c0_i32_0 = arith.constant 0 : i32
    %c0_i32_1 = arith.constant 0 : i32
    return %c0_i32, %c0_i32_0 : i32, i32
  }
  func.func @transform_4(%arg0: i32, %arg1: i32, %arg2: i32) -> (i32, i32, i32) {
    %0 = arith.muli %arg2, %arg1 : i32
    %c0_i32 = arith.constant 0 : i32
    %c0_i32_0 = arith.constant 0 : i32
    return %arg0, %c0_i32, %0 : i32, i32, i32
  }
}

</mosaic_0001>

<bundles_post_ra>
// kernel: tpu_custom_call.1
= control target key start
LH: loop header
LB: loop body
LE: loop exit
PB: predicated region body
PF: predicated region fallthrough
CT: control target
= control target key end

     0   :  { %9 = vsyncpa [#allocation5], 0  ;;  %s1804_s0 = inlined_call_operand.vmem [shape: f32[2,8,128], index: 0, kind: input, shape index: {}]   ;;  %s1805_s1 = inlined_call_operand.vmem [shape: f32[32,16], index: 1, kind: input, shape index: {}]   ;;  %s1806_s2 = inlined_call_operand.vmem [shape: f32[128,32], index: 2, kind: input, shape index: {}]   ;;  %s1807_s3 = inlined_call_operand.vmem [shape: f32[128,1], index: 3, kind: input, shape index: {}]   ;;  %s1808_s4 = inlined_call_operand.hbm [shape: f32[2,128,128], index: 4, kind: output, shape index: {}]  }
   0x1   :  { %11 = vsyncpa [#allocation5 + $0x1], 0  ;;  %s1382_s15 = smov 0   ;;  %s1384_s16 = smov 0  }
   0x2   :  { %s1386_s17 = smov 0   ;;  %s1388_s18 = smov 0  }
   0x3   :  { %s1390_s19 = smov 0   ;;  %s1392_s20 = smov 0  }
   0x4   :  { %s1394_s21 = smov 0   ;;  %s1396_s22 = smov 0  }
   0x5 LB: > { %s1066_s23 = sadd.s32 4294967295, %s1349_s22   ;;  %s1067_s24 = sadd.s32 4294967294, %s1349_s22   ;;  %s1349_s22 = sphi %s1396_s22, %s17_s22   ;;  %s1345_s21 = sphi %s1394_s21, %s1817_s21   ;;  %s1341_s20 = sphi %s1392_s20, %s1816_s20   ;;  %s1337_s19 = sphi %s1390_s19, %s1815_s19   ;;  %s1333_s18 = sphi %s1388_s18, %s1814_s18   ;;  %s1329_s17 = sphi %s1386_s17, %s1813_s17   ;;  %s1325_s16 = sphi %s1384_s16, %s1812_s16   ;;  %s1321_s15 = sphi %s1382_s15, %s1811_s15  }
   0x6   : > { %s32_s25 = sadd.s32 1, %s1341_s20  ;;  %s36_s26 = sadd.s32 1, %s1345_s21 }
   0x7   : > { %p34_p0 = scmp.ge.s32.totalorder %s32_s25, 2  ;;  %p148_p1 = scmp.ne.s32.totalorder %s1329_s17, %s1325_s16 }
   0x8   : > { %p149_p2 = scmp.eq.s32.totalorder %s1066_s23, 3  ;;  %p154_p4 = scmp.ne.s32.totalorder %s1325_s16, %s1321_s15 }
   0x9   : > { %s1819_s25 = smov (%p34_p0, %s32_s25), 0  ;;  %s1821_s26 = smov (!%p34_p0, %s36_s26), %s1345_s21 }
   0xa   : > { %p1431_p3 = por %p149_p2, %p148_p1  ;;  %p38_p5 = scmp.ge.s32.totalorder %s1821_s26, 2 }
   0xb   : > { %p155_p6 = scmp.eq.s32.totalorder %s1067_s24, 3  ;;  %p1070_p7 = scmp.ge.s32.totalorder %s1349_s22, 1 }
   0xc   : > { %p192_p8 = scmp.lt.s32.totalorder %s1349_s22, 5  ;;  %s1823_s26 = smov (%p38_p5, %s1821_s26), 0 }
   0xd   : > { %p1441_p9 = por %p155_p6, %p154_p4  ;;  %s133_s29 = ssub.s32 %s1345_s21, %s1823_s26 }
   0xe   : > { %p193_p10 = pnand %p1070_p7, %p192_p8  ;;  %s138_s30 = sadd.s32 1, %s1329_s17 }
   0xf   : > { %p136_p11 = scmp.eq.s32.totalorder %s133_s29, 0  ;;  %s217_s6 = sand.u32 (!%p193_p10), 1, %s1325_s16  }
  0x10   : > { %196 = sbr.rel (%p193_p10) target bundleno = 932 (0x3a4), region = 36  ;;  %p220_p12 = scmp.lt.s32.totalorder (!%p193_p10), %s1337_s19, 1 }
  0x11   : > { %s1449_s5 = scalar_select %p136_p11, %s1329_s17, %s138_s30  }
  0x12   : > { %s1455_s7 = sshll.u32 (!%p193_p10), %s217_s6, 7  ;;  %p1073_p13 = scmp.ne.s32.totalorder (!%p193_p10), %s1333_s18, 0 }
  0x13   : > { %s1468_s13 = scalar_lea.vmem (!%p193_p10), [#allocation4], %s1455_s7 }
  0x15   : > { %vm268_vm0 = vcmask 1040384   ;;  %s221_s8 = scalar_select %p220_p12, %s1337_s19, 1  ;;  %vm269_vm1 = vcmask 1041408   ;;  %vm271_vm2 = vcmask 1042432   ;;  %vm273_vm3 = vcmask 1043456  }
  0x16   : > { %vm275_vm4 = vcmask 1044480   ;;  %vm277_vm5 = vcmask 1045504   ;;  %vm279_vm6 = vcmask 1046528  }
  0x17   : > { %s1072_s9 = sshll.u32 %s221_s8, 3 }
  0x18   : > { %s226_s12 = scalar_lea.vmem %s1804_s0, %s1072_s9 }
  0x19   : > { %v229_v0 = vld [vmem:[%s226_s12] sm:$0xff] }
  0x1a   : > { %1242 = vrcp.f32 %v229_v0  ;;  %v232_v1 = vrot.slane %v229_v0, 6 }
  0x1c   : > { %v234_v2 = vsub.f32 %v229_v0, %v232_v1 }
  0x1e   : > { %v235_v3 = vadd.f32 1.0, %v234_v2 }
  0x20   : > { %v1243_v4 = vpop.eup %1242  ;;  %v236_v5 = vmul.f32 0.5, %v235_v3 }
  0x21   : > { %v242_v6 = vrot.slane %v1243_v4, 2  ;;  %v245_v8 = vrot.slane %v1243_v4, 4 }
  0x22   : > { %v238_v7 = vrot.slane %v236_v5, 2 }
  0x23   : > { %v244_v9 = vmul.f32 %v242_v6, %v235_v3  ;;  %v248_v11 = vmul.f32 %v245_v8, %v229_v0  ;;  %v249_v14 = vmul.f32 %v242_v6, %v229_v0 }
  0x24   : > { %v240_v10 = vadd.f32 %v238_v7, %v229_v0 }
  0x25   : > { %v251_v12 = vrot.slane %v244_v9, 1  ;;  %v254_v15 = vrot.slane %v244_v9, 2  ;;  %v260_v18 = vrot.slane %v248_v11, 4  ;;  %v263_v20 = vrot.slane %v249_v14, 4 }
  0x26   : > { %v247_v13 = vmul.f32 %v245_v8, %v240_v10 }
  0x27   : > { %v1461_v16 = vmul.f32 %v251_v12, %v244_v9 }
  0x28   : > { %v257_v17 = vrot.slane %v247_v13, 6 }
  0x29   : > { %v266_v19 = vrot.slane %v1461_v16, 2 }
  0x2a   : > { %v270_v21 = vsel %vm269_vm1, %v254_v15, %v257_v17 }
  0x2b   : > { %v272_v22 = vsel %vm271_vm2, %v270_v21, %v257_v17  ;;  %284 = sbr.rel (%p1073_p13) target bundleno = 194 (0xc2), region = 40 }
  0x2c   : > { %v274_v23 = vsel %vm273_vm3, %v272_v22, %v260_v18 }
  0x2d   : > { %v276_v24 = vsel %vm275_vm4, %v274_v23, %v260_v18 }
  0x2e   : > { %v278_v25 = vsel %vm277_vm5, %v276_v24, %v263_v20 }
  0x2f   : > { %v1465_v26 = vsel %vm279_vm6, %v278_v25, %v263_v20 }
  0x30   : > { %vm289_vm7 = vcmask 130048   ;;  %v292_v27 = vlaneseq  ;;  %v1351_v28 = vmov 0.0   ;;  %v1076_v30 = vadd.f32 -0.25, %v266_v19 }
  0x31   : > { %290 = vst.msk [vmem:[#allocation2] sm:$0xff] %vm289_vm7, %v1351_v28  ;;  %v1075_v32 = vadd.f32 -0.25, %v1465_v26 }
  0x32   : > { %291 = vst.msk [vmem:[#allocation2 + $0x8] sm:$0xff] %vm289_vm7, %v1351_v28  ;;  %v293_v29 = vand.u32 127, %v292_v27 }
  0x34   : > { %vm297_vm8 = vcmp.lt.s32.totalorder %v293_v29, 16 }
  0x35   : > { %v1074_v31 = vsel %vm297_vm8, 1.0, %v1351_v28 }
  0x36   : > { %v303_v33 = vmul.f32 %v1076_v30, %v1074_v31  ;;  %v302_v35 = vmul.f32 %v1075_v32, %v1074_v31 }
  0x38   : > { %v304_v34 = vsel %vm268_vm0, %v303_v33, %v1074_v31  ;;  %v306_v36 = vld [vmem:[#allocation2] sm:$0xff] }
  0x39   : > { %1077 = vmatpush.xpose.msk.msra.mxu0 %vm269_vm1, %v304_v34  ;;  %1158 = vmatpush.xpose.msk.msra.mxu1 %vm269_vm1, %v304_v34  ;;  %v307_v37 = vld [vmem:[#allocation2 + $0x8] sm:$0xff] }
  0x3d   : > { %323 = vmatpush.xpose.msra.mxu0 %v302_v35  ;;  %1159 = vmatpush.xpose.msra.mxu1 %v302_v35 }
  0x40   : > { %324 = vmatmul.f32.vlgmr.msra.gmra.mxu0 %v302_v35  ;;  %1078 = vmatmul.msk.f32.vlgmr.msra.gmra.mxu1 %vm269_vm1, %v304_v34 }
  0xbd   : > { %v325_v38 = vpop.f32.mrf.mxu0  ;;  %v328_v39 = vpop.f32.mrf.mxu1 }
  0xbe   : > { %v331_v40 = vadd.f32 %v325_v38, %v306_v36  ;;  %v332_v41 = vadd.f32 %v328_v39, %v307_v37 }
  0xc0   : > { %334 = vst.msk [vmem:[#allocation2] sm:$0xff] %vm289_vm7, %v331_v40 }
  0xc1   : > { %335 = vst.msk [vmem:[#allocation2 + $0x8] sm:$0xff] %vm289_vm7, %v332_v41 }
  0xc2 PF: > { %p1079_p0 = scmp.ne.s32.totalorder %s1333_s18, 1 }
  0xc4   : > { %339 = sbr.rel (%p1079_p0) target bundleno = 916 (0x394), region = 48 }
  0xc9   : > { %v345_v42 = vld [vmem:[#allocation2 + $0x8] sm:$0xff]  ;;  %v344_v43 = vld [vmem:[#allocation2] sm:$0xff]  ;;  %vm356_vm9 = vcmask 130048   ;;  %v1500_v46 = vld [vmem:[%s1805_s1 + $0x10] sm:$0xff]  ;;  %v1352_v33 = vmov 0  }
  0xca   : > { %395 = vmatpush.msra.mxu0 %v345_v42  ;;  %v1486_v44 = vld [vmem:[%s1805_s1] sm:$0xff]  ;;  %v1493_v45 = vld [vmem:[%s1805_s1 + $0x8] sm:$0xff]  ;;  %v1507_v47 = vld [vmem:[%s1805_s1 + $0x18] sm:$0xff]  ;;  %v350_v48 = vmul.f32 0.0625, %v345_v42  ;;  %v492_v9 = vsel %vm356_vm9, %v1500_v46, 0.0  ;;  %1245 = vset.pattern.permute.xlu1 %v1352_v33 }
  0xcb   : > { %v495_v62 = vsel %vm356_vm9, %v1507_v47, 0.0  ;;  %v486_v3 = vsel %vm356_vm9, %v1486_v44, 0.0  ;;  %v489_v7 = vsel %vm356_vm9, %v1493_v45, 0.0  ;;  %v550_v34 = vld [vmem:[%s1807_s3 + $0x38] sm:$0xff]  ;;  %1244 = vset.pattern.permute.xlu0 %v1352_v33  ;;  %1246 = vset.pattern.permute.xlu2 %v1352_v33 }
  0xcc   : > { %396 = vmatpush.msra.mxu0 %v344_v43  ;;  %v351_v49 = vperm.slane %v350_v48, 1 }
  0xcd   : > { %1080 = vmatmul.msk.f32.vlgmr.msra.gmra.mxu0 %vm356_vm9, %v1486_v44 }
  0xce   : > { %v353_v50 = vmul.f32 %v351_v49, %v1493_v45  ;;  %v354_v52 = vmul.f32 %v351_v49, %v1500_v46  ;;  %v355_v54 = vmul.f32 %v351_v49, %v1507_v47  ;;  %v352_v6 = vmul.f32 %v351_v49, %v1486_v44 }
  0xd0   : > { %v360_v51 = vsel %vm356_vm9, %v353_v50, 0.0  ;;  %v363_v53 = vsel %vm356_vm9, %v354_v52, 0.0  ;;  %v366_v55 = vsel %vm356_vm9, %v355_v54, 0.0  ;;  %v357_v8 = vsel %vm356_vm9, %v352_v6, 0.0  ;;  %v553_v50 = vld [vmem:[%s1807_s3 + $0x50] sm:$0xff] }
  0xd1   : > { %361 = vadd.xlane.f32.xlu2 %v360_v51  ;;  %364 = vadd.xlane.f32.xlu1 %v363_v53 }
  0xd2   : > { %367 = vadd.xlane.f32.xlu0 %v366_v55 }
  0xd5   : > { %1081 = vmatmul.msk.f32.gmra.mxu0 %vm356_vm9, %v1493_v45 }
  0xdd   : > { %1082 = vmatmul.msk.f32.gmra.mxu0 %vm356_vm9, %v1500_v46 }
  0xe5   : > { %1083 = vmatmul.msk.f32.gmra.mxu0 %vm356_vm9, %v1507_v47 }
 0x144   : > { %v1535_v10 = vpop.xlane.xlu2 %361  ;;  %v1537_v11 = vpop.xlane.xlu1 %364 }
 0x145   : > { %v431_v12 = vmul.f32 %v1535_v10, %v1535_v10  ;;  %v1541_v18 = vpop.xlane.xlu0 %367  ;;  %v432_v20 = vmul.f32 %v1537_v11, %v1537_v11 }
 0x146   : > { %v433_v29 = vmul.f32 %v1541_v18, %v1541_v18 }
 0x14a   : > { %v398_v56 = vpop.f32.mrf.mxu0 }
 0x14b   : > { %v410_v0 = vmul.f32 %v398_v56, %v1486_v44 }
 0x14d   : > { %v414_v4 = vsel %vm356_vm9, %v410_v0, 0.0 }
 0x152   : > { %v401_v57 = vpop.f32.mrf.mxu0 }
 0x153   : > { %v411_v58 = vmul.f32 %v401_v57, %v1493_v45 }
 0x155   : > { %v417_v59 = vsel %vm356_vm9, %v411_v58, 0.0 }
 0x156   : > { %418 = vadd.xlane.f32.xlu2 %v417_v59 }
 0x15a   : > { %v404_v60 = vpop.f32.mrf.mxu0 }
 0x15b   : > { %v412_v61 = vmul.f32 %v404_v60, %v1500_v46 }
 0x15d   : > { %v420_v63 = vsel %vm356_vm9, %v412_v61, 0.0 }
 0x15e   : > { %496 = vadd.xlane.f32.xlu2 %v495_v62  ;;  %421 = vadd.xlane.f32.xlu1 %v420_v63  ;;  %v506_v62 = vlaneseq }
 0x162   : > { %v407_v1 = vpop.f32.mrf.mxu0 }
 0x163   : > { %v413_v2 = vmul.f32 %v407_v1, %v1507_v47 }
 0x165   : > { %v423_v5 = vsel %vm356_vm9, %v413_v2, 0.0  ;;  %v543_v2 = vld [vmem:[%s1807_s3] sm:$0xff] }
 0x166   : > { %415 = vadd.xlane.f32.xlu1 %v414_v4  ;;  %424 = vadd.xlane.f32.xlu0 %v423_v5 }
 0x167   : > { %487 = vadd.xlane.f32.xlu2 %v486_v3  ;;  %v549_v3 = vld [vmem:[%s1807_s3 + $0x30] sm:$0xff] }
 0x16e   : > { %490 = vadd.xlane.f32.xlu1 %v489_v7  ;;  %358 = vadd.xlane.f32.xlu0 %v357_v8 }
 0x176   : > { %493 = vadd.xlane.f32.xlu0 %v492_v9  ;;  %v507_v9 = vand.u32 127, %v506_v62  ;;  %v555_v62 = vld [vmem:[%s1807_s3 + $0x60] sm:$0xff] }
 0x178   : > { %vm508_vm5 = vcmp.eq.s32.totalorder %v507_v9, 9  ;;  %v533_v9 = vld [vmem:[%s1806_s2 + $0x30] sm:$0xff] }
 0x187   : > { %596 = vperm.xlu1 %1245, %v550_v34  }
 0x18a   : > { %591 = vperm.xlu0 %1244, %v549_v3   ;;  %v531_v3 = vld [vmem:[%s1806_s2 + $0x20] sm:$0xff] }
 0x18f   : > { %611 = vperm.xlu1 %1245, %v553_v50  }
 0x197   : > { %561 = vperm.xlu1 %1245, %v543_v2   ;;  %v546_v2 = vld [vmem:[%s1807_s3 + $0x18] sm:$0xff] }
 0x1c9   : > { %v419_v13 = vpop.xlane.xlu2 %418 }
 0x1ca   : > { %v427_v14 = vmul.f32 0.0625, %v419_v13 }
 0x1cc   : > { %v435_v15 = vsub.f32 %v427_v14, %v431_v12 }
 0x1ce   : > { %v439_v17 = vmax.f32 %v435_v15, 0.0 }
 0x1d0   : > { %v1545_v22 = vadd.f32 1e-05, %v439_v17 }
 0x1d1   : > { %v422_v21 = vpop.xlane.xlu1 %421  ;;  %v497_v0 = vpop.xlane.xlu2 %496 }
 0x1d2   : > { %v428_v23 = vmul.f32 0.0625, %v422_v21  ;;  %1247 = vrsqrt.f32 %v1545_v22  ;;  %v501_v7 = vmul.f32 0.25, %v497_v0  ;;  %vm462_vm14 = vweird.f32 %v1545_v22  ;;  %v530_v0 = vld [vmem:[%s1806_s2 + $0x18] sm:$0xff] }
 0x1d4   : > { %v436_v24 = vsub.f32 %v428_v23, %v432_v20  ;;  %v505_v23 = vadd.f32 %v501_v7, %v1541_v18  ;;  %v532_v7 = vld [vmem:[%s1806_s2 + $0x28] sm:$0xff] }
 0x1d6   : > { %v440_v25 = vmax.f32 %v436_v24, 0.0 }
 0x1d8   : > { %v444_v27 = vadd.f32 1e-05, %v440_v25  ;;  %v1550_v31 = vpop.eup %1247 }
 0x1d9   : > { %v425_v28 = vpop.xlane.xlu0 %424  ;;  %v457_v36 = vmul.f32 %v1550_v31, %v1545_v22  ;;  %v416_v37 = vpop.xlane.xlu1 %415  ;;  %vm463_vm11 = vweird.f32 %v1550_v31 }
 0x1da   : > { %1249 = vrsqrt.f32 %v444_v27  ;;  %v429_v30 = vmul.f32 0.0625, %v425_v28  ;;  %v426_v42 = vmul.f32 0.0625, %v416_v37  ;;  %vm472_vm12 = vweird.f32 %v444_v27  ;;  %vm464_vm2 = vmor %vm462_vm14, %vm463_vm11  ;;  %v488_v24 = vpop.xlane.xlu2 %487 }
 0x1db   : > { %v458_v48 = vmul.f32 %v1550_v31, %v457_v36  ;;  %v498_v18 = vmul.f32 0.25, %v488_v24  ;;  %vm1354_vm11 = vmmov 1  }
 0x1dc   : > { %v437_v32 = vsub.f32 %v429_v30, %v433_v29 }
 0x1dd   : > { %v459_v54 = vmul.f32 0.5, %v458_v48 }
 0x1de   : > { %v441_v35 = vmax.f32 %v437_v32, 0.0  ;;  %v1353_v32 = vmov 0.0  }
 0x1df   : > { %v460_v63 = vsub.f32 1.5, %v459_v54  ;;  %v1581_v33 = vsel %vm508_vm5, 1.0, %v1353_v32  ;;  %v536_v54 = vld [vmem:[%s1806_s2 + $0x48] sm:$0xff] }
 0x1e0   : > { %v1250_v38 = vpop.eup %1249  ;;  %v445_v39 = vadd.f32 1e-05, %v441_v35 }
 0x1e1   : > { %v467_v40 = vmul.f32 %v1250_v38, %v444_v27  ;;  %v1557_v41 = vpop.xlane.xlu0 %358  ;;  %v491_v59 = vpop.xlane.xlu1 %490  ;;  %vm473_vm10 = vweird.f32 %v1250_v38  ;;  %v461_v12 = vmul.f32 %v1550_v31, %v460_v63  ;;  %v548_v63 = vld [vmem:[%s1807_s3 + $0x28] sm:$0xff] }
 0x1e2   : > { %1251 = vrsqrt.f32 %v445_v39  ;;  %v430_v43 = vmul.f32 %v1557_v41, %v1557_v41  ;;  %v499_v4 = vmul.f32 0.25, %v491_v59  ;;  %vm474_vm15 = vmor %vm472_vm12, %vm473_vm10  ;;  %vm482_vm3 = vweird.f32 %v445_v39  ;;  %v557_v59 = vld [vmem:[%s1807_s3 + $0x70] sm:$0xff] }
 0x1e3   : > { %v468_v49 = vmul.f32 %v1250_v38, %v467_v40  ;;  %v465_v25 = vsel %vm464_vm2, %v1550_v31, %v461_v12  ;;  %vm655_vm10 = vcmask 261120   ;;  %v542_v12 = vld [vmem:[%s1806_s2 + $0x78] sm:$0xff]  ;;  %vm1133_vm12 = vmpackc.low %vm269_vm1, %vm1354_vm11 }
 0x1e4   : > { %v434_v51 = vsub.f32 %v426_v42, %v430_v43  ;;  %v503_v15 = vadd.f32 %v499_v4, %v1535_v10  ;;  %v544_v10 = vld [vmem:[%s1807_s3 + $0x8] sm:$0xff]  ;;  %v502_v42 = vadd.f32 %v498_v18, %v1557_v41 }
 0x1e5   : > { %v469_v52 = vmul.f32 0.5, %v468_v49  ;;  %566 = vperm.xlu0 %1244, %v544_v10   ;;  %v551_v49 = vld [vmem:[%s1807_s3 + $0x40] sm:$0xff]  ;;  %v540_v4 = vld [vmem:[%s1806_s2 + $0x68] sm:$0xff] }
 0x1e6   : > { %v438_v53 = vmax.f32 %v434_v51, 0.0  ;;  %v516_v22 = vmul.f32 %v503_v15, %v465_v25  ;;  %601 = vperm.xlu2 %1246, %v551_v49  }
 0x1e7   : > { %v470_v57 = vsub.f32 1.5, %v469_v52 }
 0x1e8   : > { %v1252_v55 = vpop.eup %1251  ;;  %v442_v56 = vadd.f32 1e-05, %v438_v53  ;;  %v527_v53 = vld [vmem:[%s1806_s2] sm:$0xff] }
 0x1e9   : > { %v477_v58 = vmul.f32 %v1252_v55, %v445_v39  ;;  %v494_v60 = vpop.xlane.xlu0 %493  ;;  %v471_v6 = vmul.f32 %v1250_v38, %v470_v57  ;;  %vm483_vm13 = vweird.f32 %v1252_v55  ;;  %v520_v39 = vmul.f32 %v1581_v33, %v516_v22  ;;  %v537_v57 = vld [vmem:[%s1806_s2 + $0x50] sm:$0xff] }
 0x1ea   : > { %1253 = vrsqrt.f32 %v442_v56  ;;  %v500_v61 = vmul.f32 0.25, %v494_v60  ;;  %vm484_vm4 = vmor %vm482_vm3, %vm483_vm13  ;;  %vm452_vm7 = vweird.f32 %v442_v56  ;;  %v529_v60 = vld [vmem:[%s1806_s2 + $0x10] sm:$0xff]  ;;  %vm785_vm13 = vcmask 125952  }
 0x1eb   : > { %v478_v1 = vmul.f32 %v1252_v55, %v477_v58  ;;  %v475_v20 = vsel %vm474_vm15, %v1250_v38, %v471_v6  ;;  %v554_v58 = vld [vmem:[%s1807_s3 + $0x58] sm:$0xff] }
 0x1ec   : > { %v504_v8 = vadd.f32 %v500_v61, %v1537_v11  ;;  %v513_v38 = vmul.f32 %v475_v20, %v1500_v46  ;;  %v545_v46 = vld [vmem:[%s1807_s3 + $0x10] sm:$0xff]  ;;  %v538_v61 = vld [vmem:[%s1806_s2 + $0x58] sm:$0xff] }
 0x1ed   : > { %v479_v5 = vmul.f32 0.5, %v478_v1  ;;  %571 = vperm.xlu0 %1244, %v545_v46   ;;  %v539_v1 = vld [vmem:[%s1806_s2 + $0x60] sm:$0xff]  ;;  %v558_v6 = vld [vmem:[%s1807_s3 + $0x78] sm:$0xff] }
 0x1ee   : > { %v517_v11 = vmul.f32 %v504_v8, %v475_v20  ;;  %v541_v8 = vld [vmem:[%s1806_s2 + $0x70] sm:$0xff] }
 0x1ef   : > { %v480_v13 = vsub.f32 1.5, %v479_v5  ;;  %v547_v5 = vld [vmem:[%s1807_s3 + $0x20] sm:$0xff] }
 0x1f0   : > { %v1254_v14 = vpop.eup %1253  ;;  %v521_v31 = vmul.f32 %v1581_v33, %v517_v11 }
 0x1f1   : > { %v447_v17 = vmul.f32 %v1254_v14, %v442_v56  ;;  %v481_v21 = vmul.f32 %v1252_v55, %v480_v13  ;;  %vm453_vm6 = vweird.f32 %v1254_v14  ;;  %v528_v56 = vld [vmem:[%s1806_s2 + $0x8] sm:$0xff]  ;;  %v534_v13 = vld [vmem:[%s1806_s2 + $0x38] sm:$0xff] }
 0x1f2   : > { %vm454_vm8 = vmor %vm452_vm7, %vm453_vm6  ;;  %v525_v43 = vsub.f32 %v513_v38, %v521_v31 }
 0x1f3   : > { %v448_v27 = vmul.f32 %v1254_v14, %v447_v17  ;;  %v485_v28 = vsel %vm484_vm4, %v1252_v55, %v481_v21  ;;  %v556_v55 = vld [vmem:[%s1807_s3 + $0x68] sm:$0xff]  ;;  %v802_v21 = vsel %vm268_vm0, %v266_v19, 1.0 }
 0x1f4   : > { %v518_v29 = vmul.f32 %v505_v23, %v485_v28  ;;  %v514_v34 = vmul.f32 %v485_v28, %v1507_v47  ;;  %v512_v47 = vmul.f32 %v465_v25, %v1493_v45  ;;  %626 = vperm.xlu1 %1245, %v556_v55   ;;  %v1134_v11 = vpack.c.bf16 %v802_v21, %v1465_v26 }
 0x1f5   : > { %v449_v30 = vmul.f32 0.5, %v448_v27  ;;  %636 = vperm.xlu0 %1244, %v558_v6  }
 0x1f6   : > { %v522_v35 = vmul.f32 %v1581_v33, %v518_v29  ;;  %v524_v51 = vsub.f32 %v512_v47, %v520_v39  ;;  %1135 = vmatpush.bf16.msk.msrb.mxu0 %vm1133_vm12, %v1134_v11  ;;  %1164 = vmatpush.bf16.msk.msra.mxu2 %vm1133_vm12, %v1134_v11 }
 0x1f7   : > { %v450_v36 = vsub.f32 1.5, %v449_v30 }
 0x1f8   : > { %v526_v37 = vsub.f32 %v514_v34, %v522_v35 }
 0x1f9   : > { %v451_v40 = vmul.f32 %v1254_v14, %v450_v36  ;;  %v1689_v15 = vpop.permute.xlu1 %596 }
 0x1fa   : > { %716 = vmatpush.msra.mxu1 %v526_v37  ;;  %1160 = vmatpush.msra.mxu3 %v526_v37 }
 0x1fb   : > { %v455_v48 = vsel %vm454_vm8, %v1254_v14, %v451_v40  ;;  %v535_v14 = vld [vmem:[%s1806_s2 + $0x40] sm:$0xff] }
 0x1fc   : > { %v515_v50 = vmul.f32 %v502_v42, %v455_v48  ;;  %717 = vmatpush.msra.mxu1 %v525_v43  ;;  %1161 = vmatpush.msra.mxu3 %v525_v43  ;;  %v511_v41 = vmul.f32 %v455_v48, %v1486_v44  ;;  %v552_v44 = vld [vmem:[%s1807_s3 + $0x48] sm:$0xff]  ;;  %v1698_v24 = vpop.permute.xlu0 %591 }
 0x1fd   : > { %606 = vperm.xlu2 %1246, %v552_v44   ;;  %631 = vperm.xlu1 %1245, %v557_v59   ;;  %v645_v21 = vmul.f32 %v1581_v33, %v1698_v24 }
 0x1fe   : > { %718 = vmatpush.msra.mxu1 %v524_v51  ;;  %1162 = vmatpush.msra.mxu3 %v524_v51  ;;  %v519_v45 = vmul.f32 %v1581_v33, %v515_v50 }
 0x200   : > { %v523_v52 = vsub.f32 %v511_v41, %v519_v45 }
 0x201   : > { %v612_v20 = vpop.permute.xlu1 %611 }
 0x202   : > { %719 = vmatpush.msra.mxu1 %v523_v52  ;;  %1163 = vmatpush.msra.mxu3 %v523_v52  ;;  %v649_v37 = vmul.f32 %v1581_v33, %v612_v20 }
 0x203   : > { %1085 = vmatmul.msk.f32.vlgmr.msra.gmra.mxu1 %vm655_vm10, %v527_v53  ;;  %1094 = vmatmul.msk.f32.vlgmr.msra.gmra.mxu3 %vm655_vm10, %v536_v54 }
 0x205   : > { %616 = vperm.xlu2 %1246, %v554_v58   ;;  %586 = vperm.xlu1 %1245, %v548_v63  }
 0x209   : > { %v562_v25 = vpop.permute.xlu1 %561 }
 0x20a   : > { %v639_v28 = vmul.f32 %v1581_v33, %v562_v25 }
 0x20b   : > { %1086 = vmatmul.msk.f32.gmra.mxu1 %vm655_vm10, %v528_v56  ;;  %1095 = vmatmul.msk.f32.gmra.mxu3 %vm655_vm10, %v537_v57 }
 0x20d   : > { %621 = vperm.xlu2 %1246, %v555_v62  }
 0x213   : > { %1087 = vmatmul.msk.f32.gmra.mxu1 %vm655_vm10, %v529_v60  ;;  %1096 = vmatmul.msk.f32.gmra.mxu3 %vm655_vm10, %v538_v61 }
 0x215   : > { %576 = vperm.xlu2 %1246, %v546_v2  }
 0x21b   : > { %1088 = vmatmul.msk.f32.gmra.mxu1 %vm655_vm10, %v530_v0  ;;  %1097 = vmatmul.msk.f32.gmra.mxu3 %vm655_vm10, %v539_v1 }
 0x21d   : > { %581 = vperm.xlu2 %1246, %v547_v5  }
 0x223   : > { %1089 = vmatmul.msk.f32.gmra.mxu1 %vm655_vm10, %v531_v3  ;;  %1098 = vmatmul.msk.f32.gmra.mxu3 %vm655_vm10, %v540_v4 }
 0x22b   : > { %1090 = vmatmul.msk.f32.gmra.mxu1 %vm655_vm10, %v532_v7  ;;  %1099 = vmatmul.msk.f32.gmra.mxu3 %vm655_vm10, %v541_v8 }
 0x233   : > { %1091 = vmatmul.msk.f32.gmra.mxu1 %vm655_vm10, %v533_v9  ;;  %1100 = vmatmul.msk.f32.gmra.mxu3 %vm655_vm10, %v542_v12 }
 0x23b   : > { %1092 = vmatmul.msk.f32.gmra.mxu1 %vm655_vm10, %v534_v13 }
 0x240   : > { %v1691_v17 = vpop.permute.xlu2 %601 }
 0x243   : > { %1093 = vmatmul.msk.f32.gmra.mxu1 %vm655_vm10, %v535_v14 }
 0x257   : > { %v607_v23 = vpop.permute.xlu2 %606  ;;  %v567_v22 = vpop.permute.xlu0 %566 }
 0x258   : > { %v648_v16 = vmul.f32 %v1581_v33, %v607_v23  ;;  %v640_v26 = vmul.f32 %v1581_v33, %v567_v22 }
 0x25f   : > { %v617_v27 = vpop.permute.xlu2 %616  ;;  %v572_v36 = vpop.permute.xlu0 %571 }
 0x260   : > { %v641_v39 = vmul.f32 %v1581_v33, %v572_v36  ;;  %v650_v50 = vmul.f32 %v1581_v33, %v617_v27 }
 0x266   : > { %v627_v42 = vpop.permute.xlu1 %626 }
 0x267   : > { %v622_v32 = vpop.permute.xlu2 %621  ;;  %v652_v3 = vmul.f32 %v1581_v33, %v627_v42  ;;  %v637_v27 = vpop.permute.xlu0 %636 }
 0x268   : > { %v651_v58 = vmul.f32 %v1581_v33, %v622_v32 }
 0x26f   : > { %v577_v48 = vpop.permute.xlu2 %576  ;;  %v632_v44 = vpop.permute.xlu1 %631 }
 0x270   : > { %v642_v45 = vmul.f32 %v1581_v33, %v577_v48  ;;  %v653_v14 = vmul.f32 %v1581_v33, %v632_v44 }
 0x277   : > { %v582_v57 = vpop.permute.xlu2 %581  ;;  %v587_v2 = vpop.permute.xlu1 %586 }
 0x278   : > { %v643_v60 = vmul.f32 %v1581_v33, %v582_v57  ;;  %v644_v6 = vmul.f32 %v1581_v33, %v587_v2 }
 0x280   : > { %v721_v10 = vpop.f32.mrf.mxu1 }
 0x281   : > { %v722_v29 = vadd.f32 %v721_v10, %v639_v28 }
 0x283   : > { %v769_v19 = vpack.c.bf16 %v722_v29, %v722_v29  ;;  %v654_v29 = vmul.f32 %v1581_v33, %v637_v27 }
 0x285   : > { %786 = vst.msk [vmem:[#allocation3] sm:$0xf] %vm785_vm13, %v769_v19  ;;  %v646_v19 = vmul.f32 %v1581_v33, %v1689_v15 }
 0x286   : > { %v748_v30 = vpop.f32.mrf.mxu3 }
 0x287   : > { %v749_v18 = vadd.f32 %v748_v30, %v648_v16 }
 0x288   : > { %v724_v34 = vpop.f32.mrf.mxu1 }
 0x289   : > { %v725_v35 = vadd.f32 %v724_v34, %v640_v26  ;;  %v778_v31 = vpack.c.bf16 %v749_v18, %v749_v18 }
 0x28b   : > { %v770_v38 = vpack.c.bf16 %v725_v35, %v725_v35  ;;  %795 = vst.msk [vmem:[#allocation3 + $0x24] sm:$0xf] %vm785_vm13, %v778_v31  ;;  %v647_v35 = vmul.f32 %v1581_v33, %v1691_v17 }
 0x28d   : > { %787 = vst.msk [vmem:[#allocation3 + $0x4] sm:$0xf] %vm785_vm13, %v770_v38 }
 0x28e   : > { %v751_v40 = vpop.f32.mrf.mxu3 }
 0x28f   : > { %v752_v43 = vadd.f32 %v751_v40, %v649_v37 }
 0x290   : > { %v727_v47 = vpop.f32.mrf.mxu1 }
 0x291   : > { %v728_v49 = vadd.f32 %v727_v47, %v641_v39  ;;  %v779_v46 = vpack.c.bf16 %v752_v43, %v752_v43 }
 0x293   : > { %v771_v51 = vpack.c.bf16 %v728_v49, %v728_v49  ;;  %796 = vst.msk [vmem:[#allocation3 + $0x28] sm:$0xf] %vm785_vm13, %v779_v46 }
 0x294   : > { %v1149_v41 = vld [vmem:[#allocation3] sm:$0xff] }
 0x295   : > { %788 = vst.msk [vmem:[#allocation3 + $0x8] sm:$0xf] %vm785_vm13, %v771_v51  ;;  %1136 = vmatmul.msk.bf16.vlgmr.msrb.gmra.mxu0 %vm356_vm9, %v1149_v41 }
 0x296   : > { %v754_v52 = vpop.f32.mrf.mxu3 }
 0x297   : > { %v755_v53 = vadd.f32 %v754_v52, %v650_v50 }
 0x298   : > { %v730_v54 = vpop.f32.mrf.mxu1 }
 0x299   : > { %v731_v55 = vadd.f32 %v730_v54, %v642_v45  ;;  %v780_v56 = vpack.c.bf16 %v755_v53, %v755_v53 }
 0x29b   : > { %v772_v59 = vpack.c.bf16 %v731_v55, %v731_v55  ;;  %797 = vst.msk [vmem:[#allocation3 + $0x2c] sm:$0xf] %vm785_vm13, %v780_v56 }
 0x29d   : > { %789 = vst.msk [vmem:[#allocation3 + $0xc] sm:$0xf] %vm785_vm13, %v772_v59 }
 0x29e   : > { %v757_v61 = vpop.f32.mrf.mxu3 }
 0x29f   : > { %v758_v62 = vadd.f32 %v757_v61, %v651_v58 }
 0x2a0   : > { %v733_v63 = vpop.f32.mrf.mxu1 }
 0x2a1   : > { %v734_v0 = vadd.f32 %v733_v63, %v643_v60  ;;  %v781_v1 = vpack.c.bf16 %v758_v62, %v758_v62 }
 0x2a2   : > { %v1154_v39 = vld [vmem:[#allocation3 + $0x28] sm:$0xff] }
 0x2a3   : > { %v773_v4 = vpack.c.bf16 %v734_v0, %v734_v0  ;;  %798 = vst.msk [vmem:[#allocation3 + $0x30] sm:$0xf] %vm785_vm13, %v781_v1 }
 0x2a4   : > { %v1150_v5 = vld [vmem:[#allocation3 + $0x8] sm:$0xff] }
 0x2a5   : > { %790 = vst.msk [vmem:[#allocation3 + $0x10] sm:$0xf] %vm785_vm13, %v773_v4  ;;  %1137 = vmatmul.msk.bf16.gmra.mxu0 %vm356_vm9, %v1150_v5 }
 0x2a6   : > { %v760_v7 = vpop.f32.mrf.mxu3 }
 0x2a7   : > { %v761_v8 = vadd.f32 %v760_v7, %v652_v3 }
 0x2a8   : > { %v736_v9 = vpop.f32.mrf.mxu1 }
 0x2a9   : > { %v737_v12 = vadd.f32 %v736_v9, %v644_v6  ;;  %v782_v13 = vpack.c.bf16 %v761_v8, %v761_v8 }
 0x2ab   : > { %v774_v20 = vpack.c.bf16 %v737_v12, %v737_v12  ;;  %799 = vst.msk [vmem:[#allocation3 + $0x34] sm:$0xf] %vm785_vm13, %v782_v13 }
 0x2ad   : > { %791 = vst.msk [vmem:[#allocation3 + $0x14] sm:$0xf] %vm785_vm13, %v774_v20 }
 0x2ae   : > { %v763_v23 = vpop.f32.mrf.mxu3 }
 0x2af   : > { %v764_v11 = vadd.f32 %v763_v23, %v653_v14 }
 0x2b0   : > { %v739_v25 = vpop.f32.mrf.mxu1 }
 0x2b1   : > { %v740_v28 = vadd.f32 %v739_v25, %v645_v21  ;;  %v783_v10 = vpack.c.bf16 %v764_v11, %v764_v11 }
 0x2b2   : > { %v1155_v33 = vld [vmem:[#allocation3 + $0x30] sm:$0xff] }
 0x2b3   : > { %v775_v22 = vpack.c.bf16 %v740_v28, %v740_v28  ;;  %800 = vst.msk [vmem:[#allocation3 + $0x38] sm:$0xf] %vm785_vm13, %v783_v10 }
 0x2b4   : > { %v1151_v16 = vld [vmem:[#allocation3 + $0x10] sm:$0xff] }
 0x2b5   : > { %792 = vst.msk [vmem:[#allocation3 + $0x18] sm:$0xf] %vm785_vm13, %v775_v22  ;;  %1138 = vmatmul.msk.bf16.gmra.mxu0 %vm356_vm9, %v1151_v16 }
 0x2b6   : > { %v766_v24 = vpop.f32.mrf.mxu3 }
 0x2b7   : > { %v767_v26 = vadd.f32 %v766_v24, %v654_v29 }
 0x2b8   : > { %v742_v30 = vpop.f32.mrf.mxu1 }
 0x2b9   : > { %v743_v32 = vadd.f32 %v742_v30, %v646_v19  ;;  %v784_v18 = vpack.c.bf16 %v767_v26, %v767_v26 }
 0x2bb   : > { %v776_v34 = vpack.c.bf16 %v743_v32, %v743_v32  ;;  %801 = vst.msk [vmem:[#allocation3 + $0x3c] sm:$0xf] %vm785_vm13, %v784_v18 }
 0x2bd   : > { %793 = vst.msk [vmem:[#allocation3 + $0x1c] sm:$0xf] %vm785_vm13, %v776_v34 }
 0x2c0   : > { %v745_v31 = vpop.f32.mrf.mxu1 }
 0x2c1   : > { %v746_v15 = vadd.f32 %v745_v31, %v647_v35 }
 0x2c2   : > { %v1156_v17 = vld [vmem:[#allocation3 + $0x38] sm:$0xff] }
 0x2c3   : > { %v777_v36 = vpack.c.bf16 %v746_v15, %v746_v15 }
 0x2c4   : > { %v1152_v37 = vld [vmem:[#allocation3 + $0x18] sm:$0xff] }
 0x2c5   : > { %794 = vst.msk [vmem:[#allocation3 + $0x20] sm:$0xf] %vm785_vm13, %v777_v36  ;;  %1139 = vmatmul.msk.bf16.vlgmr.msra.gmra.mxu2 %vm356_vm9, %v1152_v37 }
 0x2cc   : > { %v1153_v38 = vld [vmem:[#allocation3 + $0x20] sm:$0xff] }
 0x2d5   : > { %1140 = vmatmul.msk.bf16.gmra.mxu2 %vm356_vm9, %v1153_v38 }
 0x2e5   : > { %1141 = vmatmul.msk.bf16.gmra.mxu2 %vm356_vm9, %v1154_v39 }
 0x2f5   : > { %1142 = vmatmul.msk.bf16.gmra.mxu2 %vm356_vm9, %v1155_v33 }
 0x305   : > { %1143 = vmatmul.msk.bf16.gmra.mxu2 %vm356_vm9, %v1156_v17 }
 0x312   : > { %v895_v40 = vpop.f32.mrf.mxu0 }
 0x313   : > { %v935_v42 = vmax.f32 %v895_v40, 0.0 }
 0x315   : > { %951 = vst [vmem:[%s1468_s13] sm:$0xff] %v935_v42 }
 0x31a   : > { %v897_v43 = vpop.f32.mrf.mxu0 }
 0x31b   : > { %v936_v47 = vmax.f32 %v897_v43, 0.0 }
 0x31d   : > { %952 = vst [vmem:[%s1468_s13 + $0x8] sm:$0xff] %v936_v47 }
 0x322   : > { %v900_v48 = vpop.f32.mrf.mxu0 }
 0x323   : > { %v937_v49 = vmax.f32 %v900_v48, 0.0 }
 0x325   : > { %953 = vst [vmem:[%s1468_s13 + $0x10] sm:$0xff] %v937_v49 }
 0x32a   : > { %v902_v46 = vpop.f32.mrf.mxu0 }
 0x32b   : > { %v938_v50 = vmax.f32 %v902_v46, 0.0 }
 0x32d   : > { %954 = vst [vmem:[%s1468_s13 + $0x18] sm:$0xff] %v938_v50 }
 0x332   : > { %v905_v51 = vpop.f32.mrf.mxu0 }
 0x333   : > { %v939_v41 = vmax.f32 %v905_v51, 0.0 }
 0x335   : > { %955 = vst [vmem:[%s1468_s13 + $0x20] sm:$0xff] %v939_v41 }
 0x33a   : > { %v907_v45 = vpop.f32.mrf.mxu0 }
 0x33b   : > { %v940_v52 = vmax.f32 %v907_v45, 0.0 }
 0x33d   : > { %956 = vst [vmem:[%s1468_s13 + $0x28] sm:$0xff] %v940_v52 }
 0x348   : > { %v910_v53 = vpop.f32.mrf.mxu2 }
 0x349   : > { %v941_v54 = vmax.f32 %v910_v53, 0.0 }
 0x34b   : > { %957 = vst [vmem:[%s1468_s13 + $0x30] sm:$0xff] %v941_v54 }
 0x350   : > { %v912_v44 = vpop.f32.mrf.mxu2 }
 0x351   : > { %v942_v55 = vmax.f32 %v912_v44, 0.0 }
 0x353   : > { %958 = vst [vmem:[%s1468_s13 + $0x38] sm:$0xff] %v942_v55 }
 0x358   : > { %v915_v56 = vpop.f32.mrf.mxu2 }
 0x359   : > { %v943_v57 = vmax.f32 %v915_v56, 0.0 }
 0x35b   : > { %959 = vst [vmem:[%s1468_s13 + $0x40] sm:$0xff] %v943_v57 }
 0x360   : > { %v917_v58 = vpop.f32.mrf.mxu2 }
 0x361   : > { %v944_v59 = vmax.f32 %v917_v58, 0.0 }
 0x363   : > { %960 = vst [vmem:[%s1468_s13 + $0x48] sm:$0xff] %v944_v59 }
 0x368   : > { %v920_v60 = vpop.f32.mrf.mxu2 }
 0x369   : > { %v945_v61 = vmax.f32 %v920_v60, 0.0 }
 0x36b   : > { %961 = vst [vmem:[%s1468_s13 + $0x50] sm:$0xff] %v945_v61 }
 0x370   : > { %v922_v62 = vpop.f32.mrf.mxu2 }
 0x371   : > { %v946_v63 = vmax.f32 %v922_v62, 0.0 }
 0x373   : > { %962 = vst [vmem:[%s1468_s13 + $0x58] sm:$0xff] %v946_v63 }
 0x378   : > { %v925_v0 = vpop.f32.mrf.mxu2 }
 0x379   : > { %v947_v1 = vmax.f32 %v925_v0, 0.0 }
 0x37b   : > { %963 = vst [vmem:[%s1468_s13 + $0x60] sm:$0xff] %v947_v1 }
 0x380   : > { %v927_v2 = vpop.f32.mrf.mxu2 }
 0x381   : > { %v948_v3 = vmax.f32 %v927_v2, 0.0 }
 0x383   : > { %964 = vst [vmem:[%s1468_s13 + $0x68] sm:$0xff] %v948_v3 }
 0x388   : > { %v930_v4 = vpop.f32.mrf.mxu2 }
 0x389   : > { %v949_v5 = vmax.f32 %v930_v4, 0.0 }
 0x38b   : > { %965 = vst [vmem:[%s1468_s13 + $0x70] sm:$0xff] %v949_v5 }
 0x390   : > { %v932_v6 = vpop.f32.mrf.mxu2 }
 0x391   : > { %v950_v7 = vmax.f32 %v932_v6, 0.0 }
 0x393   : > { %966 = vst [vmem:[%s1468_s13 + $0x78] sm:$0xff] %v950_v7 }
 0x394 PF: > { %s1157_s14 = sshll.u32 %s1337_s19, 7  ;;  %s982_s18 = sshll.u32 %s1468_s13, 4  ;;  %s983_s18 = int_to_ptr.vmem [resolvable:$true] %s982_s18 }
 0x395   : > { %s981_s29 = scalar_lea.hbm %s1808_s4, %s1157_s14  ;;  %s968_s7 = scalar_lea.sflag [#allocation5], %s217_s6 }
 0x396   : > { %s984_s30 = sshll.u32 %s981_s29, 4  ;;  %s1275_s19 = scalar_lea.hbm %s1808_s4, 256  ;;  %s985_s30 = int_to_ptr.hbm [resolvable:$true] %s984_s30 }
 0x397   : > { %s1269_s8 = sshra.s32 %s985_s30, 4  ;;  %s1270_s8 = int_to_ptr.hbm [resolvable:$true] %s1269_s8 }
 0x398   : > { %s1271_s9 = scalar_lea.hbm %s1270_s8, 128  ;;  %p1276_p5 = scmp.lt.s32.totalorder %s1270_s8, %s1808_s4 }
 0x399   : > { %p1272_p1 = scmp.ne.s32.totalorder %s1270_s8, %s1271_s9  ;;  %p1277_p6 = scmp.lt.s32.totalorder %s1275_s19, %s1271_s9 }
 0x39b   : > { %p1273_p2 = pnand %p1272_p1, %p1431_p3  ;;  %p1278_p7 = por %p1277_p6, %p1276_p5 }
 0x39d   : > { %p1274_p4 = pneg %p1273_p2 }
 0x39f   : > { %p1279_p8 = pnand %p1278_p7, %p1274_p4 }
 0x3a1   : > { %1282 = shalt.err (!%p1279_p8)
}
 0x3a2   : > { %s1355_s6 = smov 128   ;;  %s1356_s13 = smov 8  }
 0x3a3   : > { %1165 = dma.vmem_to_hbm [thread:$0]  (%p1431_p3), %s983_s18, 2048, %s985_s30, %s968_s7, %s1355_s6, %s1355_s6, %s1356_s13  }
 0x3a4 PF: > { %p1171_p10 = scmp.ge.s32.totalorder %s1349_s22, 2  ;;  %s999_s14 = sand.u32 1, %s1321_s15  }
 0x3a5   : > { %s1000_s24 = scalar_lea.sflag [#allocation5], %s999_s14 }
 0x3a6   : > { %p1168_p11 = pnand %p1171_p10, %p1441_p9 }
 0x3a8   : > { %p1169_p12 = pneg %p1168_p11 }
 0x3aa   : > { %1316 = dma.done.wait (%p1169_p12), %s1000_s24, 2048  }
 0x3ab   : > { %1318 = vsyncadd (%p1169_p12), %s1000_s24, 4294965248  ;;  %s17_s22 = sadd.s32 1, %s1349_s22   ;;  %s1811_s15 = smov %s1325_s16 }
 0x3ac   : > { %p14_p13 = scmp.ge.s32.totalorder %s17_s22, 6   ;;  %s1812_s16 = smov %s1329_s17 }
 0x3ad   : > { %s1813_s17 = smov %s1449_s5  ;;  %s1814_s18 = smov %s1341_s20 }
 0x3ae   : > { %s1815_s19 = smov %s1345_s21  ;;  %s1816_s20 = smov %s1819_s25 }
 0x3af   : > { %s1817_s21 = smov %s1823_s26  ;;  %16 = sbr.rel (!%p14_p13) target bundleno = 5 (0x5), region = 87 }
 0x3b4   :  { %1006 = vsyncpa [#allocation5], 1 }
 0x3b5   :  { %1008 = vsyncpa [#allocation5 + $0x1], 1 }

</bundles_post_ra>
